<compile_context>
chip_gen: v5e
topology: v5e:2x2
jax: 0.10.0
libtpu: 0.0.40
codegen_flags: <defaults>
</compile_context>

<pallas_src>
import functools

import jax
import jax.numpy as jnp
from jax.experimental import pallas as pl
from jax.experimental.pallas import tpu as pltpu

LANE = 128
MB = 1024 * 1024


def _round_up(x: int, m: int) -> int:
    return ((x + m - 1) // m) * m


# ----------------------------------------------------------------------------- hardware
def _tpu_generation() -> str:
    try:
        kind = jax.devices()[0].device_kind.lower()
    except Exception:
        kind = ""
    for g in ("v7", "v6", "v5"):
        if g in kind:
            return g
    return "unknown"


def _vmem_capacity_bytes(gen: str) -> int:
    try:
        cap = int(pltpu.get_tpu_info().vmem_capacity_bytes)
        if cap > 0:
            return cap
    except Exception:
        pass
    return {"v5": 128 * MB, "v6": 128 * MB, "v7": 64 * MB}.get(gen, 64 * MB)


# -------------------------------------------------------------------- VMEM accounting
def _fused_weight_bytes(dims, pdims) -> int:
    n_layers = len(dims) - 1
    b = dims[0] * pdims[1] * 2                     # layer-0 weight keeps its unpadded K
    for li in range(1, n_layers):
        b += pdims[li] * pdims[li + 1] * 2         # bf16 weights, single-buffered
    b += sum(pdims[1:]) * 4                        # f32 bias rows
    return b


def _fused_tile_bytes(dims, pdims, tm: int) -> int:
    max_n = max(pdims[1:])
    return (2 * tm * dims[0] * 4                   # f32 x tile, double-buffered
            + 2 * tm * pdims[-1] * 4               # f32 out tile, double-buffered
            + tm * max_n * 4                       # f32 matmul accumulator working set
            + tm * max_n * 2)                      # bf16 activation working set


def _pick_tm(M, dims, pdims, budget, gen) -> int:
    w_bytes = _fused_weight_bytes(dims, pdims)
    cap = 512 if gen in ("v6", "v7") else 256      # v5e's 128-wide MXU doesn't need >256 rows
    if M <= cap and w_bytes + _fused_tile_bytes(dims, pdims, M) <= budget:
        tm = M                                     # single block == full batch (always legal)
    else:
        tm = min(cap, _round_up(M, 16))
        tm -= tm % 16
        while tm > 16 and w_bytes + _fused_tile_bytes(dims, pdims, tm) > budget:
            tm -= 16
        tm = max(tm, 16)
    if gen == "v7" and M >= 512:                   # megacore: even #steps, >=256-row tiles
        steps = pl.cdiv(M, tm)
        if steps % 2 == 1:
            alt = _round_up(pl.cdiv(M, steps + 1), 16)
            if alt >= 256 and w_bytes + _fused_tile_bytes(dims, pdims, alt) <= budget:
                tm = alt
    return tm


# ------------------------------------------------------------------------------ prepare
def prepare_mlp(params, mode=None):
    """One-time padding/casting of the weights (outside the per-call path).

    params: list of (w, b) with w: (in, out) f32, b: (out,) f32 (nn.Linear, stored [in, out]).
    Returns (flat_params, meta): flat_params = (w1, b1, ..., wL, bL) padded device arrays.
    """
    dims = tuple([params[0][0].shape[0]] + [w.shape[1] for w, _ in params])
    pdims = tuple(_round_up(d, LANE) for d in dims)

    gen = _tpu_generation()
    capacity = _vmem_capacity_bytes(gen)
    vmem_limit = int(min(capacity - 16 * MB, 100 * MB))
    budget = int(vmem_limit * 0.85)                # headroom for compiler-internal scratch

    if mode is None:
        resident = _fused_weight_bytes(dims, pdims) + _fused_tile_bytes(dims, pdims, 256)
        mode = "fused" if resident <= budget else "blocked"

    flat = []
    for li, (w, b) in enumerate(params):
        k_pad = dims[li] if (mode == "fused" and li == 0) else pdims[li]
        w_p = jnp.pad(w, ((0, k_pad - dims[li]), (0, pdims[li + 1] - dims[li + 1])))
        b_p = jnp.pad(b, (0, pdims[li + 1] - dims[li + 1])).reshape(1, pdims[li + 1])
        flat.append(w_p.astype(jnp.bfloat16))
        flat.append(b_p.astype(jnp.float32))

    meta = dict(mode=mode, gen=gen, bf16_epilogue=gen in ("v6", "v7"),
                dims=dims, pdims=pdims, vmem_limit=vmem_limit, budget=budget)
    return tuple(flat), meta


# ------------------------------------------------------------------- fused (resident) path
def _fused_mlp_kernel(*refs, n_layers, bf16_epilogue):
    """refs = (x, w1, b1, ..., wL, bL, out); everything lives in VMEM.

    x: (tm, D0) f32, w_i: (K_i, pN_i) bf16, b_i: (1, pN_i) f32, out: (tm, pN_L) f32.
    """
    x_ref, o_ref, prm = refs[0], refs[-1], refs[1:-1]
    h = x_ref[...].astype(jnp.bfloat16)                     # in-kernel cast: free VPU work
    for li in range(n_layers):
        w_ref, b_ref = prm[2 * li], prm[2 * li + 1]
        acc = jnp.dot(h, w_ref[...], preferred_element_type=jnp.float32)
        if li < n_layers - 1:
            if bf16_epilogue:                               # v6e/v7x: bf16 VPU/EUP
                h = jnp.tanh(acc.astype(jnp.bfloat16) + b_ref[...].astype(jnp.bfloat16))
            else:                                           # v5e: f32-only VPU/EUP
                h = jnp.tanh(acc + b_ref[...]).astype(jnp.bfloat16)
        else:
            o_ref[...] = (acc + b_ref[...]).astype(o_ref.dtype)   # lane-dense f32 store


def _fused_call(x, flat_params, meta):
    M = x.shape[0]
    dims, pdims = meta["dims"], meta["pdims"]
    n_layers = len(dims) - 1
    tm = _pick_tm(M, dims, pdims, meta["budget"], meta["gen"])

    in_specs = [pl.BlockSpec((tm, dims[0]), lambda i: (i, 0))]           # f32 activation tile
    for li in range(n_layers):
        k = dims[0] if li == 0 else pdims[li]
        n = pdims[li + 1]
        # Constant index_map -> single-buffer so resident weights are not duplicated in VMEM.
        in_specs.append(pl.BlockSpec((k, n), lambda i: (0, 0), pipeline_mode=pl.Buffered(1)))
        in_specs.append(pl.BlockSpec((1, n), lambda i: (0, 0), pipeline_mode=pl.Buffered(1)))
    out_spec = pl.BlockSpec((tm, pdims[-1]), lambda i: (i, 0))

    kernel = functools.partial(_fused_mlp_kernel, n_layers=n_layers,
                               bf16_epilogue=meta["bf16_epilogue"])
    return pl.pallas_call(
        kernel,
        out_shape=jax.ShapeDtypeStruct((M, pdims[-1]), jnp.float32),
        grid_spec=pltpu.PrefetchScalarGridSpec(
            num_scalar_prefetch=0,
            grid=(pl.cdiv(M, tm),),
            in_specs=in_specs,
            out_specs=out_spec),
        compiler_params=pltpu.CompilerParams(
            dimension_semantics=("parallel",),
            vmem_limit_bytes=meta["vmem_limit"]),
    )(x, *flat_params)


# ------------------------------------------------------------------ blocked fallback path
def _linear_block_kernel(x_ref, w_ref, b_ref, o_ref, acc_ref, *, apply_tanh, bf16_epilogue):
    @pl.when(pl.program_id(2) == 0)
    def _():
        acc_ref[...] = jnp.zeros_like(acc_ref)

    acc_ref[...] += jnp.dot(x_ref[...], w_ref[...], preferred_element_type=jnp.float32)

    @pl.when(pl.program_id(2) == pl.num_programs(2) - 1)
    def _():
        acc = acc_ref[...]
        if apply_tanh:
            if bf16_epilogue:
                y = jnp.tanh(acc.astype(jnp.bfloat16) + b_ref[...].astype(jnp.bfloat16))
            else:
                y = jnp.tanh(acc + b_ref[...])
        else:
            y = acc + b_ref[...]
        o_ref[...] = y.astype(o_ref.dtype)


def _pick_blocked_tile(dim, cap):
    for t in (cap, 512, 256, 128):
        if t <= cap and dim % t == 0:              # exact divisor: no garbage in K reduction
            return t
    return 128


def _blocked_linear(h, w, b, *, apply_tanh, bf16_epilogue, vmem_limit, out_dtype):
    M, K = h.shape
    N = w.shape[1]
    tm = M if M <= 256 else 256
    tn = _pick_blocked_tile(N, 512)
    tk = _pick_blocked_tile(K, 512)
    kernel = functools.partial(_linear_block_kernel, apply_tanh=apply_tanh,
                               bf16_epilogue=bf16_epilogue)
    return pl.pallas_call(
        kernel,
        out_shape=jax.ShapeDtypeStruct((M, N), out_dtype),
        grid_spec=pltpu.PrefetchScalarGridSpec(
            num_scalar_prefetch=0,
            grid=(pl.cdiv(M, tm), N // tn, K // tk),
            in_specs=[pl.BlockSpec((tm, tk), lambda i, j, k: (i, k)),
                      pl.BlockSpec((tk, tn), lambda i, j, k: (k, j)),
                      pl.BlockSpec((1, tn), lambda i, j, k: (0, j))],
            out_specs=pl.BlockSpec((tm, tn), lambda i, j, k: (i, j)),
            scratch_shapes=[pltpu.VMEM((tm, tn), jnp.float32)]),
        compiler_params=pltpu.CompilerParams(
            dimension_semantics=("parallel", "parallel", "arbitrary"),
            vmem_limit_bytes=vmem_limit),
    )(h, w, b)


def _blocked_call(x, flat_params, meta):
    dims, pdims = meta["dims"], meta["pdims"]
    n_layers = len(dims) - 1
    h = jnp.pad(x.astype(jnp.bfloat16), ((0, 0), (0, pdims[0] - dims[0])))
    for li in range(n_layers):
        last = li == n_layers - 1
        h = _blocked_linear(h, flat_params[2 * li], flat_params[2 * li + 1],
                            apply_tanh=not last,
                            bf16_epilogue=meta["bf16_epilogue"],
                            vmem_limit=meta["vmem_limit"],
                            out_dtype=jnp.float32 if last else jnp.bfloat16)
    return h


# ------------------------------------------------------------------------------- wrapper
def _forward(x, flat_params, *, meta):
    if meta["mode"] == "fused":
        out_p = _fused_call(x, flat_params, meta)
    else:
        out_p = _blocked_call(x, flat_params, meta)
    return out_p[:, : meta["dims"][-1]]            # inside jit: un-pad slice fuses downstream


def make_mlp_forward(params, mode=None):
    """Prepare once (pad/cast weights) and return a jitted forward: (M, in) f32 -> (M, out) f32."""
    flat, meta = prepare_mlp(params, mode=mode)
    fwd = jax.jit(functools.partial(_forward, meta=meta))
    return lambda x: fwd(x, flat)


# ------------------------------------------------------------------------ init / reference
def init_mlp_params(key, sizes, dtype=jnp.float32):
    """Matches nn.Linear default init U(-1/sqrt(fan_in), 1/sqrt(fan_in)); weights stored [in, out]."""
    params = []
    for i in range(len(sizes) - 1):
        fan_in, fan_out = sizes[i], sizes[i + 1]
        key, kw, kb = jax.random.split(key, 3)
        bound = 1.0 / float(fan_in) ** 0.5
        params.append((jax.random.uniform(kw, (fan_in, fan_out), dtype, -bound, bound),
                       jax.random.uniform(kb, (fan_out,), dtype, -bound, bound)))
    return params


def mlp_reference(x, params, *, bf16_epilogue):
    """Pure-JAX reference with the same numerics as the kernels (bf16 MXU, f32 accumulate)."""
    h = x.astype(jnp.bfloat16)
    out = None
    for i, (w, b) in enumerate(params):
        acc = jnp.dot(h, w.astype(jnp.bfloat16), preferred_element_type=jnp.float32)
        if i < len(params) - 1:
            if bf16_epilogue:
                h = jnp.tanh(acc.astype(jnp.bfloat16) + b.astype(jnp.bfloat16))
            else:
                h = jnp.tanh(acc + b.astype(jnp.float32)).astype(jnp.bfloat16)
        else:
            out = acc + b.astype(jnp.float32)
    return out


if __name__ == "__main__":
    key = jax.random.PRNGKey(0)
    k_in, k_params = jax.random.split(key)

    sizes = (32, 64, 48, 16)        # MLP(sizes): 3 Linear layers, Tanh after the first two
    batch = 64

    x = jax.random.normal(k_in, (batch, sizes[0]), dtype=jnp.float32)
    params = init_mlp_params(k_params, sizes)

    # Fully VMEM-resident fused path (auto-selected for these sizes).
    forward = make_mlp_forward(params)
    out = jax.block_until_ready(forward(x))
    assert out.shape == (batch, sizes[-1])

    bf16_ep = _tpu_generation() in ("v6", "v7")
    ref = mlp_reference(x, params, bf16_epilogue=bf16_ep)
    assert jnp.allclose(out, ref, atol=1.5e-2, rtol=1.5e-2), float(jnp.max(jnp.abs(out - ref)))

    # Also exercise the K/N-blocked fallback (used when the weight stack exceeds the VMEM budget,
    # e.g. multi-thousand hidden dims on v7x's 64 MiB-per-TC VMEM).
    forward_blocked = make_mlp_forward(params, mode="blocked")
    out_b = jax.block_until_ready(forward_blocked(x))
    assert jnp.allclose(out_b, ref, atol=1.5e-2, rtol=1.5e-2), float(jnp.max(jnp.abs(out_b - ref)))

    # Loose sanity check vs full-fp32 math.  Note: bf16 MXU operands deviate from the fp32
    # PyTorch MLP; error grows with fan-in (acceptable here, warn users for very wide layers).
    ref32 = x
    for i, (w, b) in enumerate(params):
        ref32 = ref32 @ w + b
        if i < len(params) - 1:
            ref32 = jnp.tanh(ref32)
    assert jnp.allclose(out, ref32, atol=6e-2, rtol=6e-2)

    print("KERNEL_OK")
</pallas_src>

<mosaic_0001>
module attributes {stable_mosaic.version = 11 : i64} {
  func.func @_fused_mlp_kernel(%arg0: i32, %arg1: memref<64x32xf32, #tpu.memory_space<vmem>>, %arg2: memref<32x128xbf16, #tpu.memory_space<vmem>>, %arg3: memref<1x128xf32, #tpu.memory_space<vmem>>, %arg4: memref<128x128xbf16, #tpu.memory_space<vmem>>, %arg5: memref<1x128xf32, #tpu.memory_space<vmem>>, %arg6: memref<128x128xbf16, #tpu.memory_space<vmem>>, %arg7: memref<1x128xf32, #tpu.memory_space<vmem>>, %arg8: memref<64x128xf32, #tpu.memory_space<vmem>>) attributes {dimension_semantics = [#tpu.dimension_semantics<parallel>], iteration_bounds = array<i64: 1>, scalar_prefetch = 0 : i64, scratch_operands = 0 : i64, tpu.core_type = #tpu.core_type<tc>, window_params = [{transform_indices = @transform_0, window_bounds = array<i64: 64, 32>}, {pipeline_mode = #tpu.pipeline_mode<synchronous>, transform_indices = @transform_1, window_bounds = array<i64: 32, 128>}, {pipeline_mode = #tpu.pipeline_mode<synchronous>, transform_indices = @transform_2, window_bounds = array<i64: 1, 128>}, {pipeline_mode = #tpu.pipeline_mode<synchronous>, transform_indices = @transform_3, window_bounds = array<i64: 128, 128>}, {pipeline_mode = #tpu.pipeline_mode<synchronous>, transform_indices = @transform_4, window_bounds = array<i64: 1, 128>}, {pipeline_mode = #tpu.pipeline_mode<synchronous>, transform_indices = @transform_5, window_bounds = array<i64: 128, 128>}, {pipeline_mode = #tpu.pipeline_mode<synchronous>, transform_indices = @transform_6, window_bounds = array<i64: 1, 128>}, {transform_indices = @transform_7, window_bounds = array<i64: 64, 128>}]} {
    %c0 = arith.constant 0 : index
    %c0_0 = arith.constant 0 : index
    %0 = vector.load %arg1[%c0, %c0_0] : memref<64x32xf32, #tpu.memory_space<vmem>>, vector<64x32xf32>
    %1 = arith.truncf %0 : vector<64x32xf32> to vector<64x32xbf16>
    %c0_1 = arith.constant 0 : index
    %c0_2 = arith.constant 0 : index
    %2 = vector.load %arg2[%c0_1, %c0_2] : memref<32x128xbf16, #tpu.memory_space<vmem>>, vector<32x128xbf16>
    %cst = arith.constant dense<0.000000e+00> : vector<64x128xf32>
    %3 = tpu.matmul %1, %2, %cst {dimension_numbers = #tpu.dot_dimension_numbers<[1], [0], [0], [1], [0, 0, 1, 1], [], []>} : vector<64x32xbf16>, vector<32x128xbf16>, vector<64x128xf32> -> vector<64x128xf32>
    %c0_3 = arith.constant 0 : index
    %c0_4 = arith.constant 0 : index
    %4 = vector.load %arg3[%c0_3, %c0_4] : memref<1x128xf32, #tpu.memory_space<vmem>>, vector<1x128xf32>
    %5 = vector.broadcast %4 : vector<1x128xf32> to vector<64x128xf32>
    %6 = arith.addf %3, %5 : vector<64x128xf32>
    %7 = math.tanh %6 : vector<64x128xf32>
    %8 = arith.truncf %7 : vector<64x128xf32> to vector<64x128xbf16>
    %c0_5 = arith.constant 0 : index
    %c0_6 = arith.constant 0 : index
    %9 = vector.load %arg4[%c0_5, %c0_6] : memref<128x128xbf16, #tpu.memory_space<vmem>>, vector<128x128xbf16>
    %cst_7 = arith.constant dense<0.000000e+00> : vector<64x128xf32>
    %10 = tpu.matmul %8, %9, %cst_7 {dimension_numbers = #tpu.dot_dimension_numbers<[1], [0], [0], [1], [0, 0, 1, 1], [], []>} : vector<64x128xbf16>, vector<128x128xbf16>, vector<64x128xf32> -> vector<64x128xf32>
    %c0_8 = arith.constant 0 : index
    %c0_9 = arith.constant 0 : index
    %11 = vector.load %arg5[%c0_8, %c0_9] : memref<1x128xf32, #tpu.memory_space<vmem>>, vector<1x128xf32>
    %12 = vector.broadcast %11 : vector<1x128xf32> to vector<64x128xf32>
    %13 = arith.addf %10, %12 : vector<64x128xf32>
    %14 = math.tanh %13 : vector<64x128xf32>
    %15 = arith.truncf %14 : vector<64x128xf32> to vector<64x128xbf16>
    %c0_10 = arith.constant 0 : index
    %c0_11 = arith.constant 0 : index
    %16 = vector.load %arg6[%c0_10, %c0_11] : memref<128x128xbf16, #tpu.memory_space<vmem>>, vector<128x128xbf16>
    %cst_12 = arith.constant dense<0.000000e+00> : vector<64x128xf32>
    %17 = tpu.matmul %15, %16, %cst_12 {dimension_numbers = #tpu.dot_dimension_numbers<[1], [0], [0], [1], [0, 0, 1, 1], [], []>} : vector<64x128xbf16>, vector<128x128xbf16>, vector<64x128xf32> -> vector<64x128xf32>
    %c0_13 = arith.constant 0 : index
    %c0_14 = arith.constant 0 : index
    %18 = vector.load %arg7[%c0_13, %c0_14] : memref<1x128xf32, #tpu.memory_space<vmem>>, vector<1x128xf32>
    %19 = vector.broadcast %18 : vector<1x128xf32> to vector<64x128xf32>
    %20 = arith.addf %17, %19 : vector<64x128xf32>
    %c0_15 = arith.constant 0 : index
    %c0_16 = arith.constant 0 : index
    %21 = vector.load %arg8[%c0_15, %c0_16] : memref<64x128xf32, #tpu.memory_space<vmem>>, vector<64x128xf32>
    tpu.vector_store %arg8[%c0_15, %c0_16], %20 {strides = array<i32>} : memref<64x128xf32, #tpu.memory_space<vmem>>, vector<64x128xf32>,
    return
  }
  func.func @transform_0(%arg0: i32) -> (i32, i32) {
    %c0_i32 = arith.constant 0 : i32
    %c0_i32_0 = arith.constant 0 : i32
    return %arg0, %c0_i32 : i32, i32
  }
  func.func @transform_1(%arg0: i32) -> (i32, i32) {
    %c0_i32 = arith.constant 0 : i32
    %c0_i32_0 = arith.constant 0 : i32
    %c0_i32_1 = arith.constant 0 : i32
    return %c0_i32, %c0_i32_0 : i32, i32
  }
  func.func @transform_2(%arg0: i32) -> (i32, i32) {
    %c0_i32 = arith.constant 0 : i32
    %c0_i32_0 = arith.constant 0 : i32
    %c0_i32_1 = arith.constant 0 : i32
    return %c0_i32, %c0_i32_0 : i32, i32
  }
  func.func @transform_3(%arg0: i32) -> (i32, i32) {
    %c0_i32 = arith.constant 0 : i32
    %c0_i32_0 = arith.constant 0 : i32
    %c0_i32_1 = arith.constant 0 : i32
    return %c0_i32, %c0_i32_0 : i32, i32
  }
  func.func @transform_4(%arg0: i32) -> (i32, i32) {
    %c0_i32 = arith.constant 0 : i32
    %c0_i32_0 = arith.constant 0 : i32
    %c0_i32_1 = arith.constant 0 : i32
    return %c0_i32, %c0_i32_0 : i32, i32
  }
  func.func @transform_5(%arg0: i32) -> (i32, i32) {
    %c0_i32 = arith.constant 0 : i32
    %c0_i32_0 = arith.constant 0 : i32
    %c0_i32_1 = arith.constant 0 : i32
    return %c0_i32, %c0_i32_0 : i32, i32
  }
  func.func @transform_6(%arg0: i32) -> (i32, i32) {
    %c0_i32 = arith.constant 0 : i32
    %c0_i32_0 = arith.constant 0 : i32
    %c0_i32_1 = arith.constant 0 : i32
    return %c0_i32, %c0_i32_0 : i32, i32
  }
  func.func @transform_7(%arg0: i32) -> (i32, i32) {
    %c0_i32 = arith.constant 0 : i32
    %c0_i32_0 = arith.constant 0 : i32
    return %arg0, %c0_i32 : i32, i32
  }
}

</mosaic_0001>

<bundles_post_ra>
// kernel: _forward.1
= control target key start
LH: loop header
LB: loop body
LE: loop exit
PB: predicated region body
PF: predicated region fallthrough
CT: control target
= control target key end

     0   :  { %12 = vsyncpa [#allocation3], 0  ;;  %s522_s27 = smov [#allocation2]   ;;  %s523_s29 = smov 64   ;;  %s659_s0 = inlined_call_operand.vmem [shape: f32[64,32], index: 0, kind: input, shape index: {}]   ;;  %s660_s1 = inlined_call_operand.vmem [shape: bf16[32,128], index: 1, kind: input, shape index: {}]   ;;  %s661_s2 = inlined_call_operand.vmem [shape: f32[1,128], index: 2, kind: input, shape index: {}]   ;;  %s662_s3 = inlined_call_operand.vmem [shape: bf16[128,128], index: 3, kind: input, shape index: {}]   ;;  %s663_s4 = inlined_call_operand.vmem [shape: f32[1,128], index: 4, kind: input, shape index: {}]   ;;  %s664_s5 = inlined_call_operand.hbm [shape: bf16[128,128], index: 5, kind: input, shape index: {}]   ;;  %s665_s6 = inlined_call_operand.vmem [shape: f32[1,128], index: 6, kind: input, shape index: {}]   ;;  %s666_s7 = inlined_call_operand.vmem [shape: f32[64,128], index: 7, kind: output, shape index: {}]  }
   0x1   :  { %s27_s26 = sshll.u32 %s664_s5, 4  ;;  %s29_s28 = sshll.u32 %s522_s27, 4  ;;  %s28_s26 = int_to_ptr.hbm [resolvable:$true] %s27_s26  ;;  %s30_s28 = int_to_ptr.vmem [resolvable:$true] %s29_s28 }
   0x2   :  { %s524_s30 = smov 4  }
   0x3   :  { %35 = dma.hbm_to_vmem [thread:$0]  %s28_s26, 1024, %s30_s28, [#allocation3], %s523_s29, %s523_s29, %s524_s30  }
   0x4   :  { %520 = dma.done.wait [#allocation3], 1024  }
   0x5   :  { %521 = vsyncadd [#allocation3], 4294966272  ;;  %v425_v0 = vld [vmem:[%s660_s1 + $0x8] sm:$0xff]  ;;  %v424_v1 = vld [vmem:[%s660_s1] sm:$0xff]  ;;  %vm75_vm0 = vcmask 261120  }
   0x6   :  { %94 = vmatpush.bf16.msra.mxu0 %v425_v0  ;;  %v43_v2 = vld [vmem:[%s659_s0] sm:$0xff]  ;;  %v44_v3 = vld [vmem:[%s659_s0 + $0x8] sm:$0xff]  ;;  %v45_v5 = vld [vmem:[%s659_s0 + $0x10] sm:$0xff] }
   0x7   :  { %v51_v4 = vpack.c.bf16 %v44_v3, %v43_v2  ;;  %v46_v6 = vld [vmem:[%s659_s0 + $0x18] sm:$0xff]  ;;  %v432_v9 = vld [vmem:[%s662_s3 + $0x30] sm:$0xff]  ;;  %v431_v10 = vld [vmem:[%s662_s3 + $0x28] sm:$0xff] }
   0x8   :  { %v52_v7 = vpack.c.bf16 %v46_v6, %v45_v5  ;;  %v433_v8 = vld [vmem:[%s662_s3 + $0x38] sm:$0xff]  ;;  %v47_v11 = vld [vmem:[%s659_s0 + $0x20] sm:$0xff]  ;;  %v48_v12 = vld [vmem:[%s659_s0 + $0x28] sm:$0xff] }
   0x9   :  { %197 = vmatpush.bf16.msra.mxu1 %v433_v8  ;;  %442 = vmatpush.bf16.msra.mxu3 %v433_v8  ;;  %v53_v13 = vpack.c.bf16 %v48_v12, %v47_v11  ;;  %v49_v14 = vld [vmem:[%s659_s0 + $0x30] sm:$0xff]  ;;  %v50_v15 = vld [vmem:[%s659_s0 + $0x38] sm:$0xff]  ;;  %v430_v17 = vld [vmem:[%s662_s3 + $0x20] sm:$0xff] }
   0xa   :  { %95 = vmatpush.bf16.msra.mxu0 %v424_v1  ;;  %v54_v16 = vpack.c.bf16 %v50_v15, %v49_v14  ;;  %v429_v18 = vld [vmem:[%s662_s3 + $0x18] sm:$0xff]  ;;  %v428_v19 = vld [vmem:[%s662_s3 + $0x10] sm:$0xff]  ;;  %v427_v20 = vld [vmem:[%s662_s3 + $0x8] sm:$0xff] }
   0xb   :  { %v426_v21 = vld [vmem:[%s662_s3] sm:$0xff]  ;;  %v441_v38 = vld [vmem:[#allocation2 + $0x38] sm:$0xff]  ;;  %v440_v40 = vld [vmem:[#allocation2 + $0x30] sm:$0xff] }
   0xc   :  { %v461_v23 = vld [vmem:[%s661_s2] ss:$0 sm:$0xff]  ;;  %450 = vmatpush.bf16.msra.mxu2 %v441_v38  ;;  %v439_v43 = vld [vmem:[#allocation2 + $0x28] sm:$0xff]  ;;  %v437_v55 = vld [vmem:[#allocation2 + $0x18] sm:$0xff] }
   0xd   :  { %356 = vmatmul.msk.bf16.vlgmr.msra.gmra.mxu0 %vm75_vm0, %v51_v4  ;;  %198 = vmatpush.bf16.msra.mxu1 %v432_v9  ;;  %v438_v54 = vld [vmem:[#allocation2 + $0x20] sm:$0xff]  ;;  %v436_v56 = vld [vmem:[#allocation2 + $0x10] sm:$0xff]  ;;  %v435_v57 = vld [vmem:[#allocation2 + $0x8] sm:$0xff] }
   0xe   :  { %443 = vmatpush.bf16.msra.mxu3 %v432_v9  ;;  %v434_v58 = vld [vmem:[#allocation2] sm:$0xff] }
   0xf   :  { %v462_v60 = vld [vmem:[%s663_s4] ss:$0 sm:$0xff] }
  0x10   :  { %451 = vmatpush.bf16.msra.mxu2 %v440_v40 }
  0x11   :  { %199 = vmatpush.bf16.msra.mxu1 %v431_v10 }
  0x12   :  { %444 = vmatpush.bf16.msra.mxu3 %v431_v10 }
  0x14   :  { %452 = vmatpush.bf16.msra.mxu2 %v439_v43 }
  0x15   :  { %200 = vmatpush.bf16.msra.mxu1 %v430_v17 }
  0x16   :  { %445 = vmatpush.bf16.msra.mxu3 %v430_v17 }
  0x18   :  { %453 = vmatpush.bf16.msra.mxu2 %v438_v54 }
  0x19   :  { %201 = vmatpush.bf16.msra.mxu1 %v429_v18 }
  0x1a   :  { %446 = vmatpush.bf16.msra.mxu3 %v429_v18 }
  0x1c   :  { %454 = vmatpush.bf16.msra.mxu2 %v437_v55 }
  0x1d   :  { %357 = vmatmul.msk.bf16.gmra.mxu0 %vm75_vm0, %v52_v7  ;;  %202 = vmatpush.bf16.msra.mxu1 %v428_v19 }
  0x1e   :  { %447 = vmatpush.bf16.msra.mxu3 %v428_v19 }
  0x20   :  { %455 = vmatpush.bf16.msra.mxu2 %v436_v56 }
  0x21   :  { %203 = vmatpush.bf16.msra.mxu1 %v427_v20 }
  0x22   :  { %448 = vmatpush.bf16.msra.mxu3 %v427_v20 }
  0x24   :  { %456 = vmatpush.bf16.msra.mxu2 %v435_v57 }
  0x25   :  { %204 = vmatpush.bf16.msra.mxu1 %v426_v21 }
  0x26   :  { %449 = vmatpush.bf16.msra.mxu3 %v426_v21 }
  0x28   :  { %457 = vmatpush.bf16.msra.mxu2 %v434_v58 }
  0x29   :  { %306 = vmatpush.bf16.msrb.mxu1 %v441_v38 }
  0x2d   :  { %358 = vmatmul.msk.bf16.gmra.mxu0 %vm75_vm0, %v53_v13  ;;  %307 = vmatpush.bf16.msrb.mxu1 %v440_v40 }
  0x31   :  { %308 = vmatpush.bf16.msrb.mxu1 %v439_v43 }
  0x35   :  { %309 = vmatpush.bf16.msrb.mxu1 %v438_v54 }
  0x39   :  { %310 = vmatpush.bf16.msrb.mxu1 %v437_v55 }
  0x3d   :  { %359 = vmatmul.msk.bf16.gmra.mxu0 %vm75_vm0, %v54_v16  ;;  %311 = vmatpush.bf16.msrb.mxu1 %v436_v56 }
  0x41   :  { %312 = vmatpush.bf16.msrb.mxu1 %v435_v57 }
  0x45   :  { %313 = vmatpush.bf16.msrb.mxu1 %v434_v58 }
  0x8a   :  { %v97_v22 = vpop.f32.mrf.mxu0 }
  0x8b   :  { %v98_v24 = vadd.f32 %v461_v23, %v97_v22 }
  0x8d   :  { %464 = vtanh.f32 %v98_v24  ;;  %v463_v24 = vld [vmem:[%s665_s6] ss:$0 sm:$0xff] }
  0x92   :  { %v99_v25 = vpop.f32.mrf.mxu0 }
  0x93   :  { %v100_v26 = vadd.f32 %v461_v23, %v99_v25  ;;  %v465_v27 = vpop.eup %464 }
  0x95   :  { %466 = vtanh.f32 %v100_v26 }
  0x9a   :  { %v102_v28 = vpop.f32.mrf.mxu0 }
  0x9b   :  { %v467_v29 = vpop.eup %466  ;;  %v103_v31 = vadd.f32 %v461_v23, %v102_v28 }
  0x9c   :  { %v125_v30 = vpack.c.bf16 %v467_v29, %v465_v27 }
  0x9d   :  { %468 = vtanh.f32 %v103_v31 }
  0x9e   :  { %205 = vmatmul.bf16.vlgmr.msra.gmra.mxu1 %v125_v30 }
  0xa2   :  { %v104_v32 = vpop.f32.mrf.mxu0 }
  0xa3   :  { %v105_v33 = vadd.f32 %v461_v23, %v104_v32  ;;  %v469_v34 = vpop.eup %468 }
  0xa5   :  { %470 = vtanh.f32 %v105_v33 }
  0xaa   :  { %v107_v35 = vpop.f32.mrf.mxu0 }
  0xab   :  { %v471_v36 = vpop.eup %470  ;;  %v108_v39 = vadd.f32 %v461_v23, %v107_v35 }
  0xac   :  { %v126_v37 = vpack.c.bf16 %v471_v36, %v469_v34 }
  0xad   :  { %472 = vtanh.f32 %v108_v39 }
  0xae   :  { %210 = vmatmul.bf16.vlgmr.msra.gmra.mxu3 %v126_v37 }
  0xb2   :  { %v109_v41 = vpop.f32.mrf.mxu0 }
  0xb3   :  { %v110_v42 = vadd.f32 %v461_v23, %v109_v41  ;;  %v473_v44 = vpop.eup %472 }
  0xb5   :  { %474 = vtanh.f32 %v110_v42 }
  0xba   :  { %v112_v45 = vpop.f32.mrf.mxu0 }
  0xbb   :  { %v475_v46 = vpop.eup %474  ;;  %v113_v48 = vadd.f32 %v461_v23, %v112_v45 }
  0xbc   :  { %v127_v47 = vpack.c.bf16 %v475_v46, %v473_v44 }
  0xbd   :  { %476 = vtanh.f32 %v113_v48 }
  0xbe   :  { %215 = vmatmul.bf16.gmra.mxu3 %v127_v47 }
  0xc2   :  { %v114_v49 = vpop.f32.mrf.mxu0 }
  0xc3   :  { %v115_v50 = vadd.f32 %v461_v23, %v114_v49  ;;  %v477_v51 = vpop.eup %476 }
  0xc5   :  { %478 = vtanh.f32 %v115_v50 }
  0xcb   :  { %v479_v52 = vpop.eup %478 }
  0xcc   :  { %v128_v53 = vpack.c.bf16 %v479_v52, %v477_v51 }
  0xce   :  { %220 = vmatmul.bf16.gmra.mxu3 %v128_v53 }
 0x11b   :  { %v206_v59 = vpop.f32.mrf.mxu1 }
 0x11c   :  { %v207_v61 = vadd.f32 %v462_v60, %v206_v59 }
 0x11e   :  { %480 = vtanh.f32 %v207_v61 }
 0x123   :  { %v208_v62 = vpop.f32.mrf.mxu1 }
 0x124   :  { %v209_v63 = vadd.f32 %v462_v60, %v208_v62  ;;  %v481_v0 = vpop.eup %480 }
 0x126   :  { %482 = vtanh.f32 %v209_v63 }
 0x12c   :  { %v483_v1 = vpop.eup %482 }
 0x12d   :  { %v234_v2 = vpack.c.bf16 %v483_v1, %v481_v0 }
 0x12f   :  { %314 = vmatmul.bf16.vlgmr.msrb.gmra.mxu1 %v234_v2 }
 0x131   :  { %v211_v3 = vpop.f32.mrf.mxu3 }
 0x132   :  { %v212_v4 = vadd.f32 %v462_v60, %v211_v3 }
 0x134   :  { %484 = vtanh.f32 %v212_v4 }
 0x139   :  { %v213_v5 = vpop.f32.mrf.mxu3 }
 0x13a   :  { %v214_v6 = vadd.f32 %v462_v60, %v213_v5  ;;  %v485_v7 = vpop.eup %484 }
 0x13c   :  { %486 = vtanh.f32 %v214_v6 }
 0x141   :  { %v216_v8 = vpop.f32.mrf.mxu3 }
 0x142   :  { %v487_v9 = vpop.eup %486  ;;  %v217_v11 = vadd.f32 %v462_v60, %v216_v8 }
 0x143   :  { %v235_v10 = vpack.c.bf16 %v487_v9, %v485_v7 }
 0x144   :  { %488 = vtanh.f32 %v217_v11 }
 0x145   :  { %319 = vmatmul.bf16.vlgmr.msra.gmra.mxu2 %v235_v10 }
 0x149   :  { %v218_v12 = vpop.f32.mrf.mxu3 }
 0x14a   :  { %v219_v13 = vadd.f32 %v462_v60, %v218_v12  ;;  %v489_v14 = vpop.eup %488 }
 0x14c   :  { %490 = vtanh.f32 %v219_v13 }
 0x151   :  { %v221_v15 = vpop.f32.mrf.mxu3 }
 0x152   :  { %v491_v16 = vpop.eup %490  ;;  %v222_v18 = vadd.f32 %v462_v60, %v221_v15 }
 0x153   :  { %v236_v17 = vpack.c.bf16 %v491_v16, %v489_v14 }
 0x154   :  { %492 = vtanh.f32 %v222_v18 }
 0x155   :  { %324 = vmatmul.bf16.gmra.mxu2 %v236_v17 }
 0x159   :  { %v223_v19 = vpop.f32.mrf.mxu3 }
 0x15a   :  { %v224_v20 = vadd.f32 %v462_v60, %v223_v19  ;;  %v493_v21 = vpop.eup %492 }
 0x15c   :  { %494 = vtanh.f32 %v224_v20 }
 0x162   :  { %v495_v22 = vpop.eup %494 }
 0x163   :  { %v237_v23 = vpack.c.bf16 %v495_v22, %v493_v21 }
 0x165   :  { %329 = vmatmul.bf16.gmra.mxu2 %v237_v23 }
 0x1ac   :  { %v315_v25 = vpop.f32.mrf.mxu1 }
 0x1ad   :  { %v316_v26 = vadd.f32 %v463_v24, %v315_v25 }
 0x1af   :  { %335 = vst [vmem:[%s666_s7] sm:$0xff] %v316_v26 }
 0x1b4   :  { %v317_v27 = vpop.f32.mrf.mxu1 }
 0x1b5   :  { %v318_v28 = vadd.f32 %v463_v24, %v317_v27 }
 0x1b7   :  { %336 = vst [vmem:[%s666_s7 + $0x8] sm:$0xff] %v318_v28 }
 0x1c8   :  { %v320_v29 = vpop.f32.mrf.mxu2 }
 0x1c9   :  { %v321_v30 = vadd.f32 %v463_v24, %v320_v29 }
 0x1cb   :  { %337 = vst [vmem:[%s666_s7 + $0x10] sm:$0xff] %v321_v30 }
 0x1d0   :  { %v322_v31 = vpop.f32.mrf.mxu2 }
 0x1d1   :  { %v323_v32 = vadd.f32 %v463_v24, %v322_v31 }
 0x1d3   :  { %338 = vst [vmem:[%s666_s7 + $0x18] sm:$0xff] %v323_v32 }
 0x1d8   :  { %v325_v33 = vpop.f32.mrf.mxu2 }
 0x1d9   :  { %v326_v34 = vadd.f32 %v463_v24, %v325_v33 }
 0x1db   :  { %339 = vst [vmem:[%s666_s7 + $0x20] sm:$0xff] %v326_v34 }
 0x1e0   :  { %v327_v35 = vpop.f32.mrf.mxu2 }
 0x1e1   :  { %v328_v36 = vadd.f32 %v463_v24, %v327_v35 }
 0x1e3   :  { %340 = vst [vmem:[%s666_s7 + $0x28] sm:$0xff] %v328_v36 }
 0x1e8   :  { %v330_v37 = vpop.f32.mrf.mxu2 }
 0x1e9   :  { %v331_v38 = vadd.f32 %v463_v24, %v330_v37 }
 0x1eb   :  { %341 = vst [vmem:[%s666_s7 + $0x30] sm:$0xff] %v331_v38 }
 0x1f0   :  { %v332_v39 = vpop.f32.mrf.mxu2 }
 0x1f1   :  { %v333_v40 = vadd.f32 %v463_v24, %v332_v39 }
 0x1f3   :  { %342 = vst [vmem:[%s666_s7 + $0x38] sm:$0xff] %v333_v40 }
 0x1f4   :  { %347 = vsyncpa [#allocation3], 1 }

</bundles_post_ra>
